<compile_context>
chip_gen: v5e
topology: v5e:2x2
jax: 0.10.0
libtpu: 0.0.40
codegen_flags: <defaults>
</compile_context>

<pallas_src>
import jax
import jax.numpy as jnp
from jax import lax
from jax.experimental import pallas as pl
from jax.experimental.pallas import tpu as pltpu

_NEG_BIG = jnp.float32(-1e30)   # finite "-inf" for the mask fill


def attention_kernel(tgt_ref, enc_ref, bias_ref, wf_ref, w2_ref,
                     out_ref, weights_ref):
    # Per-batch-element view (grid axis 0 == batch, "parallel"):
    #   tgt_ref     [1, Do]        decoder hidden state
    #   enc_ref     [S, Di]        encoder outputs for this batch element
    #   bias_ref    [1, S]         additive mask bias (0 or -1e30)
    #   wf_ref      [Do, Di+Do]    fused [W_src | W1] (both consume tgt)
    #   w2_ref      [Di, Do]       ctx half of the output projection
    di = enc_ref.shape[-1]

    tgt = tgt_ref[...]                                            # [1, Do]
    enc = enc_ref[...]                                            # [S, Di]

    # One MXU matmul covers both uses of tgt.
    proj = jnp.dot(tgt, wf_ref[...],
                   preferred_element_type=jnp.float32)            # [1, Di+Do]
    u = proj[:, :di]                                              # tgt @ W_src  [1, Di]
    th = proj[:, di:]                                             # tgt @ W1     [1, Do]

    # score[s] = u . enc[s, :]  — MXU "nt" contraction.
    scores = lax.dot_general(u, enc, (((1,), (1,)), ((), ())),
                             preferred_element_type=jnp.float32)  # [1, S]
    scores = scores + bias_ref[...]                               # masked fill

    # softmax over src_len (f32; normalisation via EUP approx reciprocal)
    m = jnp.max(scores, axis=-1, keepdims=True)                   # [1, 1]
    e = jnp.exp(scores - m)                                       # [1, S]
    denom = jnp.sum(e, axis=-1, keepdims=True)                    # [1, 1]
    attn_w = e * pl.reciprocal(denom, approx=True)                # [1, S]
    weights_ref[...] = attn_w

    # attention context: attn_w @ enc — MXU.
    ctx = jnp.dot(attn_w, enc, preferred_element_type=jnp.float32)    # [1, Di]

    # tanh(cat([tgt, ctx]) @ W_cph^T) == tanh(tgt@W1 + ctx@W2)
    out_ref[...] = jnp.tanh(
        th + jnp.dot(ctx, w2_ref[...], preferred_element_type=jnp.float32))


def attention_layer(tgt_input, encoder_out, src_mask, w_src, w_cph):
    """Pallas wrapper.

    tgt_input:   [B, Do]        float32
    encoder_out: [S, B, Di]     float32   (PyTorch layout)
    src_mask:    [B, S] bool or None      (True = masked position)
    w_src:       [Do, Di]       nn.Linear(input_dims, output_dims).weight
    w_cph:       [Do, Do+Di]    nn.Linear(input_dims+output_dims, output_dims).weight
    returns (attn_out [B, Do], attn_weights [B, S])
    """
    S, B, Di = encoder_out.shape
    Do = w_src.shape[0]

    enc = jnp.transpose(encoder_out, (1, 0, 2))                   # [B, S, Di]

    # cat([tgt, ctx]) @ W_cph^T = tgt @ W1 + ctx @ W2 ; W_src also consumes tgt,
    # so fuse [W_src | W1] into a single matrix (one MXU push in-kernel).
    w1 = jnp.transpose(w_cph[:, :Do])                             # [Do, Do]
    w2 = jnp.transpose(w_cph[:, Do:])                             # [Di, Do]
    w_fused = jnp.concatenate([w_src, w1], axis=1)                # [Do, Di+Do]

    # Additive mask bias with a finite fill (NaN-proof for fully-masked rows).
    if src_mask is None:
        bias = jnp.zeros((B, S), jnp.float32)
    else:
        bias = jnp.where(src_mask, _NEG_BIG, jnp.float32(0.0))

    tgt3 = tgt_input.reshape(B, 1, Do)                            # [B, 1, Do]
    bias3 = bias.reshape(B, 1, S)                                 # [B, 1, S]

    out_shapes = (jax.ShapeDtypeStruct((B, 1, Do), jnp.float32),
                  jax.ShapeDtypeStruct((B, 1, S), jnp.float32))

    out3, w3 = pl.pallas_call(
        attention_kernel,
        out_shape=out_shapes,
        grid_spec=pltpu.PrefetchScalarGridSpec(
            num_scalar_prefetch=0,
            grid=(B,),
            in_specs=[
                pl.BlockSpec((None, 1, Do), lambda b: (b, 0, 0)),   # tgt
                pl.BlockSpec((None, S, Di), lambda b: (b, 0, 0)),   # enc
                pl.BlockSpec((None, 1, S), lambda b: (b, 0, 0)),    # mask bias
                pl.BlockSpec((Do, Di + Do), lambda b: (0, 0)),      # fused tgt weights
                pl.BlockSpec((Di, Do), lambda b: (0, 0)),           # ctx weights
            ],
            out_specs=[
                pl.BlockSpec((None, 1, Do), lambda b: (b, 0, 0)),   # attn_out
                pl.BlockSpec((None, 1, S), lambda b: (b, 0, 0)),    # attn_weights
            ],
        ),
        compiler_params=pltpu.CompilerParams(
            dimension_semantics=("parallel",)),
    )(tgt3, enc, bias3, w_fused, w2)

    return out3.reshape(B, Do), w3.reshape(B, S)


def reference_forward(tgt_input, encoder_out, src_mask, w_src, w_cph):
    """Plain-JAX transcription of the PyTorch forward, for verification."""
    enc = jnp.transpose(encoder_out, (1, 0, 2))                   # [B, S, Di]
    proj = jnp.einsum('bsi,oi->bso', enc, w_src)                  # [B, S, Do]
    scores = jnp.einsum('bo,bso->bs', tgt_input, proj)            # [B, S]
    scores = jnp.where(src_mask, -jnp.inf, scores)
    w = jax.nn.softmax(scores, axis=-1)                           # [B, S]
    ctx = jnp.einsum('bs,bsi->bi', w, enc)                        # [B, Di]
    cph = jnp.concatenate([tgt_input, ctx], axis=1)               # [B, Do+Di]
    out = jnp.tanh(cph @ w_cph.T)                                 # [B, Do]
    return out, w


if __name__ == "__main__":
    # Small shapes consistent with the module
    B, S = 4, 16            # batch, src_len
    Di, Do = 32, 32         # input_dims, output_dims

    key = jax.random.PRNGKey(0)
    k1, k2, k3, k4 = jax.random.split(key, 4)

    tgt_input = jax.random.normal(k1, (B, Do), dtype=jnp.float32)
    encoder_out = jax.random.normal(k2, (S, B, Di), dtype=jnp.float32)

    # deterministic parameter init (nn.Linear weights, bias=False)
    w_src = 0.1 * jax.random.normal(k3, (Do, Di), dtype=jnp.float32)
    w_cph = 0.1 * jax.random.normal(k4, (Do, Do + Di), dtype=jnp.float32)

    # mask out the tail of each sequence (no row fully masked)
    lengths = jnp.array([S, S - 3, S - 7, S - 1], dtype=jnp.int32)
    src_mask = jnp.arange(S)[None, :] >= lengths[:, None]         # [B, S] bool

    attn_out, attn_weights = attention_layer(tgt_input, encoder_out, src_mask,
                                             w_src, w_cph)
    jax.block_until_ready((attn_out, attn_weights))

    ref_out, ref_w = reference_forward(tgt_input, encoder_out, src_mask,
                                       w_src, w_cph)

    assert attn_out.shape == (B, Do) and attn_weights.shape == (B, S)
    # tolerance accounts for the approximate (EUP) reciprocal in the softmax
    assert jnp.allclose(attn_out, ref_out, atol=5e-3, rtol=5e-3)
    assert jnp.allclose(attn_weights, ref_w, atol=5e-3, rtol=5e-3)
    assert jnp.allclose(jnp.sum(attn_weights, axis=-1), 1.0, atol=5e-3)

    print("KERNEL_OK")
</pallas_src>

<mosaic_0001>
module attributes {stable_mosaic.version = 11 : i64} {
  func.func @attention_kernel(%arg0: i32, %arg1: memref<1x1x32xf32, #tpu.memory_space<vmem>>, %arg2: memref<1x16x32xf32, #tpu.memory_space<vmem>>, %arg3: memref<1x1x16xf32, #tpu.memory_space<vmem>>, %arg4: memref<32x64xf32, #tpu.memory_space<vmem>>, %arg5: memref<32x32xf32, #tpu.memory_space<vmem>>, %arg6: memref<1x1x32xf32, #tpu.memory_space<vmem>>, %arg7: memref<1x1x16xf32, #tpu.memory_space<vmem>>) attributes {dimension_semantics = [#tpu.dimension_semantics<parallel>], iteration_bounds = array<i64: 4>, scalar_prefetch = 0 : i64, scratch_operands = 0 : i64, tpu.core_type = #tpu.core_type<tc>, window_params = [{transform_indices = @transform_0, window_bounds = array<i64: 1, 1, 32>}, {transform_indices = @transform_1, window_bounds = array<i64: 1, 16, 32>}, {transform_indices = @transform_2, window_bounds = array<i64: 1, 1, 16>}, {pipeline_mode = #tpu.pipeline_mode<synchronous>, transform_indices = @transform_3, window_bounds = array<i64: 32, 64>}, {pipeline_mode = #tpu.pipeline_mode<synchronous>, transform_indices = @transform_4, window_bounds = array<i64: 32, 32>}, {transform_indices = @transform_5, window_bounds = array<i64: 1, 1, 32>}, {transform_indices = @transform_6, window_bounds = array<i64: 1, 1, 16>}]} {
    %c0 = arith.constant 0 : index
    %c0_0 = arith.constant 0 : index
    %c0_1 = arith.constant 0 : index
    %0 = vector.load %arg1[%c0, %c0_0, %c0_1] : memref<1x1x32xf32, #tpu.memory_space<vmem>>, vector<1x1x32xf32>
    %1 = vector.shape_cast %0 : vector<1x1x32xf32> to vector<1x32xf32>
    %c0_2 = arith.constant 0 : index
    %c0_3 = arith.constant 0 : index
    %c0_4 = arith.constant 0 : index
    %2 = vector.load %arg2[%c0_2, %c0_3, %c0_4] : memref<1x16x32xf32, #tpu.memory_space<vmem>>, vector<1x16x32xf32>
    %3 = vector.shape_cast %2 : vector<1x16x32xf32> to vector<16x32xf32>
    %c0_5 = arith.constant 0 : index
    %c0_6 = arith.constant 0 : index
    %4 = vector.load %arg4[%c0_5, %c0_6] : memref<32x64xf32, #tpu.memory_space<vmem>>, vector<32x64xf32>
    %cst = arith.constant dense<0.000000e+00> : vector<1x64xf32>
    %5 = tpu.matmul %1, %4, %cst {dimension_numbers = #tpu.dot_dimension_numbers<[1], [0], [0], [1], [0, 0, 1, 1], [], []>} : vector<1x32xf32>, vector<32x64xf32>, vector<1x64xf32> -> vector<1x64xf32>
    %6 = vector.extract_strided_slice %5 {offsets = [0, 0], sizes = [1, 32], strides = [1, 1]} : vector<1x64xf32> to vector<1x32xf32>
    %7 = vector.extract_strided_slice %5 {offsets = [0, 32], sizes = [1, 32], strides = [1, 1]} : vector<1x64xf32> to vector<1x32xf32>
    %cst_7 = arith.constant dense<0.000000e+00> : vector<1x16xf32>
    %8 = tpu.matmul %6, %3, %cst_7 {dimension_numbers = #tpu.dot_dimension_numbers<[1], [1], [0], [0], [0, 0, 1, 0], [], []>} : vector<1x32xf32>, vector<16x32xf32>, vector<1x16xf32> -> vector<1x16xf32>
    %c0_8 = arith.constant 0 : index
    %c0_9 = arith.constant 0 : index
    %c0_10 = arith.constant 0 : index
    %9 = vector.load %arg3[%c0_8, %c0_9, %c0_10] : memref<1x1x16xf32, #tpu.memory_space<vmem>>, vector<1x1x16xf32>
    %10 = vector.shape_cast %9 : vector<1x1x16xf32> to vector<1x16xf32>
    %11 = arith.addf %8, %10 : vector<1x16xf32>
    %cst_11 = arith.constant dense<0xFF800000> : vector<1xf32>
    %12 = vector.multi_reduction <maximumf>, %11, %cst_11 [1] : vector<1x16xf32> to vector<1xf32>
    %13 = vector.shape_cast %12 : vector<1xf32> to vector<1x1xf32>
    %14 = vector.broadcast %13 : vector<1x1xf32> to vector<1x16xf32>
    %15 = arith.subf %11, %14 : vector<1x16xf32>
    %16 = math.exp %15 : vector<1x16xf32>
    %cst_12 = arith.constant dense<0.000000e+00> : vector<1xf32>
    %17 = vector.multi_reduction <add>, %16, %cst_12 [1] : vector<1x16xf32> to vector<1xf32>
    %18 = vector.shape_cast %17 : vector<1xf32> to vector<1x1xf32>
    %19 = tpu.reciprocal %18 {approx = true} : vector<1x1xf32> -> vector<1x1xf32>
    %20 = vector.broadcast %19 : vector<1x1xf32> to vector<1x16xf32>
    %21 = arith.mulf %16, %20 : vector<1x16xf32>
    %c0_13 = arith.constant 0 : index
    %c0_14 = arith.constant 0 : index
    %c0_15 = arith.constant 0 : index
    %22 = vector.load %arg7[%c0_13, %c0_14, %c0_15] : memref<1x1x16xf32, #tpu.memory_space<vmem>>, vector<1x1x16xf32>
    %23 = vector.shape_cast %22 : vector<1x1x16xf32> to vector<1x16xf32>
    %24 = vector.shape_cast %21 : vector<1x16xf32> to vector<1x1x16xf32>
    tpu.vector_store %arg7[%c0_13, %c0_14, %c0_15], %24 {strides = array<i32>} : memref<1x1x16xf32, #tpu.memory_space<vmem>>, vector<1x1x16xf32>,
    %cst_16 = arith.constant dense<0.000000e+00> : vector<1x32xf32>
    %25 = tpu.matmul %21, %3, %cst_16 {dimension_numbers = #tpu.dot_dimension_numbers<[1], [0], [0], [1], [0, 0, 1, 1], [], []>} : vector<1x16xf32>, vector<16x32xf32>, vector<1x32xf32> -> vector<1x32xf32>
    %c0_17 = arith.constant 0 : index
    %c0_18 = arith.constant 0 : index
    %26 = vector.load %arg5[%c0_17, %c0_18] : memref<32x32xf32, #tpu.memory_space<vmem>>, vector<32x32xf32>
    %cst_19 = arith.constant dense<0.000000e+00> : vector<1x32xf32>
    %27 = tpu.matmul %25, %26, %cst_19 {dimension_numbers = #tpu.dot_dimension_numbers<[1], [0], [0], [1], [0, 0, 1, 1], [], []>} : vector<1x32xf32>, vector<32x32xf32>, vector<1x32xf32> -> vector<1x32xf32>
    %28 = arith.addf %7, %27 : vector<1x32xf32>
    %29 = math.tanh %28 : vector<1x32xf32>
    %c0_20 = arith.constant 0 : index
    %c0_21 = arith.constant 0 : index
    %c0_22 = arith.constant 0 : index
    %30 = vector.load %arg6[%c0_20, %c0_21, %c0_22] : memref<1x1x32xf32, #tpu.memory_space<vmem>>, vector<1x1x32xf32>
    %31 = vector.shape_cast %30 : vector<1x1x32xf32> to vector<1x32xf32>
    %32 = vector.shape_cast %29 : vector<1x32xf32> to vector<1x1x32xf32>
    tpu.vector_store %arg6[%c0_20, %c0_21, %c0_22], %32 {strides = array<i32>} : memref<1x1x32xf32, #tpu.memory_space<vmem>>, vector<1x1x32xf32>,
    return
  }
  func.func @transform_0(%arg0: i32) -> (i32, i32, i32) {
    %c0_i32 = arith.constant 0 : i32
    %c0_i32_0 = arith.constant 0 : i32
    %c0_i32_1 = arith.constant 0 : i32
    return %arg0, %c0_i32, %c0_i32_0 : i32, i32, i32
  }
  func.func @transform_1(%arg0: i32) -> (i32, i32, i32) {
    %c0_i32 = arith.constant 0 : i32
    %c0_i32_0 = arith.constant 0 : i32
    %c0_i32_1 = arith.constant 0 : i32
    return %arg0, %c0_i32, %c0_i32_0 : i32, i32, i32
  }
  func.func @transform_2(%arg0: i32) -> (i32, i32, i32) {
    %c0_i32 = arith.constant 0 : i32
    %c0_i32_0 = arith.constant 0 : i32
    %c0_i32_1 = arith.constant 0 : i32
    return %arg0, %c0_i32, %c0_i32_0 : i32, i32, i32
  }
  func.func @transform_3(%arg0: i32) -> (i32, i32) {
    %c0_i32 = arith.constant 0 : i32
    %c0_i32_0 = arith.constant 0 : i32
    %c0_i32_1 = arith.constant 0 : i32
    return %c0_i32, %c0_i32_0 : i32, i32
  }
  func.func @transform_4(%arg0: i32) -> (i32, i32) {
    %c0_i32 = arith.constant 0 : i32
    %c0_i32_0 = arith.constant 0 : i32
    %c0_i32_1 = arith.constant 0 : i32
    return %c0_i32, %c0_i32_0 : i32, i32
  }
  func.func @transform_5(%arg0: i32) -> (i32, i32, i32) {
    %c0_i32 = arith.constant 0 : i32
    %c0_i32_0 = arith.constant 0 : i32
    %c0_i32_1 = arith.constant 0 : i32
    return %arg0, %c0_i32, %c0_i32_0 : i32, i32, i32
  }
  func.func @transform_6(%arg0: i32) -> (i32, i32, i32) {
    %c0_i32 = arith.constant 0 : i32
    %c0_i32_0 = arith.constant 0 : i32
    %c0_i32_1 = arith.constant 0 : i32
    return %arg0, %c0_i32, %c0_i32_0 : i32, i32, i32
  }
}

</mosaic_0001>

<bundles_post_ra>
// kernel: tpu_custom_call.1
= control target key start
LH: loop header
LB: loop body
LE: loop exit
PB: predicated region body
PF: predicated region fallthrough
CT: control target
= control target key end

     0   :  { %s1340_s0 = inlined_call_operand.hbm [shape: f32[4,1,32], index: 0, kind: input, shape index: {}]   ;;  %s1341_s1 = inlined_call_operand.hbm [shape: f32[4,16,32], index: 1, kind: input, shape index: {}]   ;;  %s1342_s2 = inlined_call_operand.hbm [shape: f32[4,1,16], index: 2, kind: input, shape index: {}]   ;;  %s1343_s3 = inlined_call_operand.hbm [shape: f32[32,64], index: 3, kind: input, shape index: {}]   ;;  %s1344_s4 = inlined_call_operand.hbm [shape: f32[32,32], index: 4, kind: input, shape index: {}]   ;;  %s1345_s5 = inlined_call_operand.hbm [shape: f32[4,1,32], index: 5, kind: output, shape index: {0}]   ;;  %s1346_s6 = inlined_call_operand.hbm [shape: f32[4,1,16], index: 6, kind: output, shape index: {1}]  }
   0x1   :  { %1356 = sst [smem:[#allocation23_spill]] %s1343_s3 }
   0x2   :  { %12 = vsyncpa [#allocation3], 0 }
   0x3   :  { %14 = vsyncpa [#allocation3 + $0x1], 0 }
   0x4   :  { %15 = vsyncpa [#allocation6], 0 }
   0x5   :  { %17 = vsyncpa [#allocation6 + $0x1], 0 }
   0x6   :  { %18 = vsyncpa [#allocation9], 0 }
   0x7   :  { %19 = vsyncpa [#allocation4], 0 }
   0x8   :  { %21 = vsyncpa [#allocation4 + $0x1], 0 }
   0x9   :  { %22 = vsyncpa [#allocation13], 0 }
   0xa   :  { %24 = vsyncpa [#allocation13 + $0x1], 0  ;;  %s1108_s21 = smov 0   ;;  %s1110_s22 = smov 0  }
   0xb   :  { %s1112_s23 = smov 0   ;;  %s1114_s24 = smov 0  }
   0xc LB: > { %1357 = sst [smem:[#allocation19_spill]] %s1061_s23  ;;  %s1129_s25 = sadd.s32 4294967295, %s1065_s24   ;;  %s1065_s24 = sphi %s1114_s24, %s1373_s24   ;;  %s1061_s23 = sphi %s1112_s23, %s1375_s23   ;;  %s1057_s22 = sphi %s1110_s22, %s1377_s22   ;;  %s1053_s21 = sphi %s1108_s21, %s1376_s21  }
   0xd   : > { %s696_s26 = sadd.s32 4294967294, %s1065_s24   ;;  %p50_p0 = scmp.ne.s32.totalorder %s1057_s22, %s1053_s21 }
   0xe   : > { %p1355_p1 = scmp.eq.s32.totalorder %s1129_s25, 0  ;;  %p168_p2 = scmp.eq.s32.totalorder %s1129_s25, 3 }
   0xf   : > { %p174_p3 = scmp.eq.s32.totalorder %s696_s26, 3  ;;  %p697_p5 = scmp.ge.s32.totalorder %s1065_s24, 1 }
  0x10   : > { %p1138_p4 = por %p1355_p1, %p50_p0  ;;  %p207_p7 = scmp.lt.s32.totalorder %s1065_s24, 5 }
  0x11   : > { %p1143_p6 = por %p174_p3, %p50_p0  ;;  %s1361_s3 = sld [smem:[#allocation23_spill]] }
  0x12   : > { %p1151_p8 = pnand %p697_p5, %p207_p7  ;;  %s1067_s9 = smov [#allocation8]  }
  0x13   : > { %s1359_s28 = scalar_select %p1143_p6, 1, 0 }
  0x14   : > { %p735_p9 = pneg %p1151_p8  ;;  %s220_s10 = sshll.u32 %s1067_s9, 4  ;;  %s221_s10 = int_to_ptr.vmem [resolvable:$true] %s220_s10 }
  0x15   : > { %1360 = sst [smem:[#allocation20_spill]] %s1359_s28  ;;  %s1164_s12 = sadd.s32 1, %s1065_s24  }
  0x16   : > { %p1159_p10 = pnand %p735_p9, %p1355_p1  ;;  %1364 = sst [smem:[#allocation21_spill]] %s1164_s12 }
  0x17   : > { %s218_s7 = sshll.u32 %s1361_s3, 4  ;;  %s1347_s13 = smov 128   ;;  %s219_s7 = int_to_ptr.hbm [resolvable:$true] %s218_s7 }
  0x18   : > { %s1349_s14 = smov 8   ;;  %s34_s15 = ssub.s32 %s1065_s24, %s1164_s12 }
  0x19   : > { %738 = dma.hbm_to_vmem [thread:$0]  (!%p1159_p10), %s219_s7, 512, %s221_s10, [#allocation9], %s1347_s13, %s1347_s13, %s1349_s14  }
  0x1a   : > { %s37_s16 = sadd.s32 1, %s1061_s23  ;;  %p35_p11 = scmp.eq.s32.totalorder %s34_s15, 0 }
  0x1b   : > { %p44_p12 = scmp.ne.s32.totalorder %s1061_s23, %s1057_s22  ;;  %p45_p13 = scmp.eq.s32.totalorder %s1065_s24, 0 }
  0x1c   : > { %p761_p0 = scmp.lt.s32.totalorder %s1065_s24, 4  ;;  %s1188_s19 = sand.u32 1, %s1061_s23  }
  0x1d   : > { %s1179_s17 = scalar_select %p35_p11, %s1061_s23, %s37_s16  }
  0x1e   : > { %p46_p3 = por %p45_p13, %p44_p12  ;;  %p1183_p5 = por %p168_p2, %p44_p12 }
  0x1f   : > { %1365 = sst [smem:[#allocation22_spill]] %s1179_s17  ;;  %s265_s20 = sand.u32 1, %s1065_s24  }
  0x20   : > { %p1191_p7 = pnand %p761_p0, %p46_p3  ;;  %s701_s29 = sshll.u32 %s1188_s19, 4 }
  0x21   : > { %s716_s30 = sshll.u32 %s1065_s24, 4  ;;  %s269_s15 = scalar_lea.vmem [#allocation5], %s701_s29 }
  0x22   : > { %s274_s10 = scalar_lea.hbm %s1341_s1, %s716_s30  ;;  %s277_s16 = sshll.u32 %s269_s15, 4  ;;  %s278_s16 = int_to_ptr.vmem [resolvable:$true] %s277_s16 }
  0x23   : > { %s275_s13 = sshll.u32 %s274_s10, 4  ;;  %s232_s17 = sshll.u32 %s1344_s4, 4  ;;  %s276_s13 = int_to_ptr.hbm [resolvable:$true] %s275_s13  ;;  %s233_s17 = int_to_ptr.hbm [resolvable:$true] %s232_s17 }
  0x24   : > { %s1203_s23 = scalar_lea.sflag [#allocation6], %s265_s20  ;;  %s839_s12 = sshra.s32 %s276_s13, 4  ;;  %s840_s12 = int_to_ptr.hbm [resolvable:$true] %s839_s12 }
  0x25   : > { %s841_s28 = scalar_lea.hbm %s840_s12, 16  ;;  %p843_p9 = pneg %p1191_p7 }
  0x26   : > { %p842_p2 = scmp.ne.s32.totalorder %s840_s12, %s841_s28  ;;  %s846_s7 = scalar_lea.hbm %s1341_s1, 64 }
  0x27   : > { %p847_p13 = scmp.lt.s32.totalorder %s840_s12, %s1341_s1  ;;  %p848_p0 = scmp.lt.s32.totalorder %s846_s7, %s841_s28 }
  0x28   : > { %p844_p11 = pnand %p843_p9, %p842_p2 }
  0x29   : > { %p849_p3 = por %p848_p0, %p847_p13 }
  0x2a   : > { %p845_p12 = pneg %p844_p11 }
  0x2c   : > { %p850_p1 = pnand %p849_p3, %p845_p12 }
  0x2e   : > { %853 = shalt.err (!%p850_p1)
}
  0x2f   : > { %s1368_s3 = smov 8   ;;  %s1369_s14 = smov 128  }
  0x30   : > { %748 = dma.hbm_to_vmem [thread:$0]  (!%p1191_p7), %s276_s13, 256, %s278_s16, %s1203_s23, %s1369_s14, %s1369_s14, %s1368_s3  }
  0x31   : > { %s1070_s20 = smov [#allocation10]   ;;  %s254_s29 = scalar_lea.hbm %s1340_s0, %s1065_s24 }
  0x32   : > { %s234_s15 = sshll.u32 %s1070_s20, 4  ;;  %s251_s30 = scalar_lea.vmem [#allocation2], %s1188_s19  ;;  %s235_s15 = int_to_ptr.vmem [resolvable:$true] %s234_s15 }
  0x33   : > { %741 = dma.hbm_to_vmem [thread:$0]  (!%p1159_p10), %s233_s17, 512, %s235_s15, [#allocation9], %s1369_s14, %s1369_s14, %s1368_s3  }
  0x34   : > { %s258_s7 = sshll.u32 %s251_s30, 4  ;;  %s256_s9 = sshll.u32 %s254_s29, 4  ;;  %s259_s7 = int_to_ptr.vmem [resolvable:$true] %s258_s7  ;;  %s257_s9 = int_to_ptr.hbm [resolvable:$true] %s256_s9 }
  0x35   : > { %s249_s13 = scalar_lea.sflag [#allocation3], %s1188_s19  ;;  %s899_s16 = sshra.s32 %s257_s9, 4  ;;  %s900_s16 = int_to_ptr.hbm [resolvable:$true] %s899_s16 }
  0x36   : > { %s901_s10 = scalar_lea.hbm %s900_s16, 1  ;;  %s906_s3 = scalar_lea.hbm %s1340_s0, 4 }
  0x37   : > { %p902_p1 = scmp.ne.s32.totalorder %s900_s16, %s901_s10  ;;  %p907_p10 = scmp.lt.s32.totalorder %s900_s16, %s1340_s0 }
  0x38   : > { %p908_p12 = scmp.lt.s32.totalorder %s906_s3, %s901_s10 }
  0x39   : > { %p904_p2 = pnand %p902_p1, %p843_p9 }
  0x3a   : > { %p909_p13 = por %p908_p12, %p907_p10 }
  0x3b   : > { %p905_p11 = pneg %p904_p2 }
  0x3d   : > { %p910_p0 = pnand %p909_p13, %p905_p11 }
  0x3f   : > { %913 = shalt.err (!%p910_p0)
}
  0x40   : > { %745 = dma.hbm_to_vmem [thread:$0]  (!%p1191_p7), %s257_s9, 16, %s259_s7, %s249_s13  }
  0x41   : > { %s293_s12 = scalar_lea.hbm %s1342_s2, %s1065_s24  ;;  %s290_s29 = scalar_lea.vmem [#allocation7], %s1188_s19 }
  0x42   : > { %s297_s30 = sshll.u32 %s290_s29, 4  ;;  %s295_s11 = sshll.u32 %s293_s12, 4  ;;  %s298_s30 = int_to_ptr.vmem [resolvable:$true] %s297_s30  ;;  %s296_s11 = int_to_ptr.hbm [resolvable:$true] %s295_s11 }
  0x43   : > { %s929_s16 = sshra.s32 %s296_s11, 4  ;;  %s936_s7 = scalar_lea.hbm %s1342_s2, 4  ;;  %s930_s16 = int_to_ptr.hbm [resolvable:$true] %s929_s16 }
  0x44   : > { %s931_s10 = scalar_lea.hbm %s930_s16, 1  ;;  %p937_p11 = scmp.lt.s32.totalorder %s930_s16, %s1342_s2 }
  0x45   : > { %p932_p3 = scmp.ne.s32.totalorder %s930_s16, %s931_s10  ;;  %p938_p10 = scmp.lt.s32.totalorder %s936_s7, %s931_s10 }
  0x47   : > { %p934_p1 = pnand %p932_p3, %p843_p9  ;;  %p939_p12 = por %p938_p10, %p937_p11 }
  0x49   : > { %p935_p2 = pneg %p934_p1 }
  0x4b   : > { %p940_p13 = pnand %p939_p12, %p935_p2 }
  0x4d   : > { %943 = shalt.err (!%p940_p13)
}
  0x4e   : > { %751 = dma.hbm_to_vmem [thread:$0]  (!%p1191_p7), %s296_s11, 16, %s298_s30, %s1203_s23  }
  0x4f   : > { %306 = sbr.rel (%p1151_p8) target bundleno = 1113 (0x459), region = 40  ;;  %s1264_s19 = sand.u32 (!%p1151_p8), 1, %s1057_s22  }
  0x50   : > { %s309_s14 = scalar_lea.sflag (!%p1151_p8), [#allocation3], %s1264_s19  ;;  %s311_s20 = scalar_lea.vmem (!%p1151_p8), [#allocation2], %s1264_s19 }
  0x54   : > { %1032 = dma.done.wait (%p1138_p4), %s309_s14, 16  }
  0x55   : > { %1034 = vsyncadd (%p1138_p4), %s309_s14, 4294967280  ;;  %s317_s23 = sand.u32 1, %s1129_s25   ;;  %s705_s26 = sshll.u32 %s1264_s19, 4 }
  0x56   : > { %s318_s8 = scalar_lea.sflag [#allocation6], %s317_s23  ;;  %s321_s15 = scalar_lea.vmem [#allocation5], %s705_s26 }
  0x57   : > { %1036 = dma.done.wait (%p1138_p4), %s318_s8, 272  }
  0x58   : > { %1038 = vsyncadd (%p1138_p4), %s318_s8, 4294967024  ;;  %s330_s28 = scalar_lea.vmem [#allocation7], %s1264_s19  ;;  %p1370_p8 = scmp.eq.s32.totalorder %s1129_s25, 0 }
  0x5a   : > { %1040 = dma.done.wait (%p1370_p8), [#allocation9], 1024   ;;  %p1371_p7 = pmov %p1370_p8 }
  0x5b   : > { %v387_v0 = vld [vmem:[#allocation8 + $0x18] sm:$0xff]  ;;  %v386_v1 = vld [vmem:[#allocation8 + $0x10] sm:$0xff]  ;;  %vm388_vm0 = vcmask 261120   ;;  %v385_v3 = vld [vmem:[#allocation8 + $0x8] sm:$0xff]  ;;  %vm442_vm1 = vcmask 122880   ;;  %vm455_vm2 = vcmask 130048   ;;  %s544_s11 = scalar_lea.hbm %s1346_s6, %s1129_s25 }
  0x5c   : > { %1042 = vsyncadd (%p1371_p7), [#allocation9], 4294966272  ;;  %404 = vmatpush.msra.mxu0 %v387_v0  ;;  %v383_v2 = vld [vmem:[%s321_s15 + $0x8] sm:$0xff]  ;;  %v382_v4 = vld [vmem:[%s321_s15] sm:$0xff]  ;;  %s380_s27 = scalar_lea.vmem [#allocation12], %s1264_s19  ;;  %s1071_s12 = smov 32  }
  0x5d   : > { %709 = vmatpush.xpose.msk.msra.mxu1 %vm388_vm0, %v383_v2  ;;  %473 = vmatpush.msra.mxu2 %v383_v2  ;;  %v384_v5 = vld [vmem:[#allocation8] sm:$0xff]  ;;  %v381_v6 = vld [vmem:[%s311_s20] sm:$0x1]  ;;  %v481_v18 = vld [vmem:[#allocation10 + $0x10] sm:$0xff]  ;;  %s546_s16 = sshll.u32 %s380_s27, 4  ;;  %s548_s10 = sshll.u32 %s544_s11, 4  ;;  %s547_s16 = int_to_ptr.vmem [resolvable:$true] %s546_s16  ;;  %s549_s10 = int_to_ptr.hbm [resolvable:$true] %s548_s10 }
  0x5e   : > { %405 = vmatpush.msra.mxu0 %v386_v1  ;;  %v412_v8 = vld [vmem:[%s330_s28] sm:$0x1]  ;;  %v480_v19 = vld [vmem:[#allocation10 + $0x8] sm:$0xff]  ;;  %v479_v23 = vld [vmem:[#allocation10] sm:$0xff]  ;;  %s523_s17 = scalar_lea.sflag [#allocation13], %s1264_s19  ;;  %s973_s3 = sshra.s32 %s549_s10, 4  ;;  %s974_s3 = int_to_ptr.hbm [resolvable:$true] %s973_s3 }
  0x5f   : > { %474 = vmatpush.msra.mxu2 %v382_v4  ;;  %v482_v17 = vld [vmem:[#allocation10 + $0x18] sm:$0xff]  ;;  %s975_s7 = scalar_lea.hbm %s974_s3, 1  ;;  %s979_s14 = scalar_lea.hbm %s1346_s6, 4 }
  0x60   : > { %406 = vmatpush.msra.mxu0 %v385_v3  ;;  %498 = vmatpush.msra.mxu3 %v482_v17  ;;  %p976_p4 = scmp.ne.s32.totalorder %s974_s3, %s975_s7  ;;  %p980_p3 = scmp.lt.s32.totalorder %s974_s3, %s1346_s6 }
  0x61   : > { %710 = vmatpush.xpose.msk.msra.mxu1 %vm388_vm0, %v382_v4  ;;  %p981_p1 = scmp.lt.s32.totalorder %s979_s14, %s975_s7 }
  0x62   : > { %407 = vmatpush.msra.mxu0 %v384_v5  ;;  %499 = vmatpush.msra.mxu3 %v481_v18  ;;  %p977_p9 = pnand %p976_p4, %p1183_p5 }
  0x63   : > { %708 = vmatmul.msk.f32.vlgmr.msra.gmra.mxu0 %vm388_vm0, %v381_v6  ;;  %p982_p2 = por %p981_p1, %p980_p3 }
  0x64   : > { %500 = vmatpush.msra.mxu3 %v480_v19  ;;  %p978_p0 = pneg %p977_p9 }
  0x66   : > { %501 = vmatpush.msra.mxu3 %v479_v23  ;;  %p983_p11 = pnand %p982_p2, %p978_p0 }
  0xe0   : > { %v409_v7 = vpop.f32.mrf.mxu0 }
  0xe1   : > { %711 = vmatmul.msk.f32.vlgmr.msra.gmra.mxu1 %vm388_vm0, %v409_v7 }
 0x15e   : > { %v439_v9 = vpop.f32.mrf.mxu1 }
 0x15f   : > { %v440_v10 = vadd.f32 %v439_v9, %v412_v8 }
 0x161   : > { %v443_v11 = vsel %vm442_vm1, %v440_v10, -inf }
 0x162   : > { %444 = vmax.xlane.f32.xlu0 %v443_v11 }
 0x1d5   : > { %v445_v12 = vpop.xlane.xlu0 %444 }
 0x1d6   : > { %v446_v13 = vsub.f32 %v440_v10, %v445_v12 }
 0x1d8   : > { %v447_v14 = vmul.f32 1.442695, %v446_v13 }
 0x1da   : > { %803 = vpow2.f32 %v447_v14 }
 0x1e0   : > { %v804_v15 = vpop.eup %803 }
 0x1e1   : > { %v449_v16 = vsel %vm442_vm1, %v804_v15, 0.0 }
 0x1e2   : > { %450 = vadd.xlane.f32.xlu0 %v449_v16 }
 0x255   : > { %v451_v20 = vpop.xlane.xlu0 %450 }
 0x256   : > { %805 = vrcp.f32 %v451_v20 }
 0x25c   : > { %v806_v21 = vpop.eup %805 }
 0x25d   : > { %v453_v22 = vmul.f32 %v806_v21, %v804_v15 }
 0x25f   : > { %712 = vmatmul.msk.f32.vlgmr.msra.gmra.mxu2 %vm455_vm2, %v453_v22  ;;  %454 = vst.msk [vmem:[%s380_s27] sm:$0x1] %vm442_vm1, %v453_v22 }
 0x2e2   : > { %v476_v24 = vpop.f32.mrf.mxu2 }
 0x2e3   : > { %713 = vmatmul.msk.f32.vlgmr.msra.gmra.mxu3 %vm388_vm0, %v476_v24 }
 0x366   : > { %v503_v25 = vpop.f32.mrf.mxu3 }
 0x367   : > { %507 = vrot.lane.b32.xlu1 %v503_v25, %s1071_s12 }
 0x3d9   : > { %v508_v26 = vpop.permute.xlu1 %507 }
 0x3da   : > { %v510_v27 = vadd.f32 %v508_v26, %v409_v7 }
 0x3db   : > { %986 = shalt.err (!%p983_p11)
}
 0x3dc   : > { %732 = dma.vmem_to_hbm [thread:$0]  (%p1183_p5), %s547_s16, 16, %s549_s10, %s523_s17   ;;  %807 = vtanh.f32 %v510_v27  ;;  %vm516_vm3 = vcmask 253952  }
 0x3dd   : > { %s1072_s26 = smov 96   ;;  %s531_s28 = scalar_lea.hbm %s1345_s5, %s1129_s25 }
 0x3de   : > { %s374_s27 = scalar_lea.vmem [#allocation11], %s1264_s19  ;;  %s535_s29 = sshll.u32 %s531_s28, 4  ;;  %s536_s29 = int_to_ptr.hbm [resolvable:$true] %s535_s29 }
 0x3df   : > { %s533_s12 = sshll.u32 %s374_s27, 4  ;;  %s519_s30 = scalar_lea.sflag [#allocation4], %s1264_s19  ;;  %s534_s12 = int_to_ptr.vmem [resolvable:$true] %s533_s12 }
 0x3e0   : > { %s1001_s11 = sshra.s32 %s536_s29, 4  ;;  %s1007_s25 = scalar_lea.hbm %s1345_s5, 4  ;;  %s1002_s11 = int_to_ptr.hbm [resolvable:$true] %s1001_s11 }
 0x3e1   : > { %s1003_s16 = scalar_lea.hbm %s1002_s11, 1  ;;  %p1008_p8 = scmp.lt.s32.totalorder %s1002_s11, %s1345_s5 }
 0x3e2   : > { %v808_v28 = vpop.eup %807  ;;  %p1004_p10 = scmp.ne.s32.totalorder %s1002_s11, %s1003_s16  ;;  %p1009_p7 = scmp.lt.s32.totalorder %s1007_s25, %s1003_s16 }
 0x3e3   : > { %513 = vrot.lane.b32.xlu1 %v808_v28, %s1072_s26 }
 0x3e4   : > { %p1005_p12 = pnand %p1004_p10, %p1183_p5  ;;  %p1010_p4 = por %p1009_p7, %p1008_p8 }
 0x3e6   : > { %p1006_p13 = pneg %p1005_p12 }
 0x3e8   : > { %p1011_p9 = pnand %p1010_p4, %p1006_p13 }
 0x455   : > { %v514_v29 = vpop.permute.xlu1 %513 }
 0x456   : > { %517 = vst.msk [vmem:[%s374_s27] sm:$0x1] %vm516_vm3, %v514_v29 }
 0x457   : > { %1014 = shalt.err (!%p1011_p9)
}
 0x458   : > { %731 = dma.vmem_to_hbm [thread:$0]  (%p1183_p5), %s534_s12, 16, %s536_s29, %s519_s30  }
 0x459 PF: > { %p764_p0 = scmp.ge.s32.totalorder %s1065_s24, 2  ;;  %s560_s9 = sand.u32 1, %s1053_s21  }
 0x45a   : > { %s561_s13 = scalar_lea.sflag [#allocation4], %s560_s9 }
 0x45b   : > { %p753_p3 = pnand %p764_p0, %p1143_p6 }
 0x45d   : > { %p754_p1 = pneg %p753_p3 }
 0x45f   : > { %1044 = dma.done.wait (%p754_p1), %s561_s13, 16  }
 0x460   : > { %1046 = vsyncadd (%p754_p1), %s561_s13, 4294967280  ;;  %s570_s14 = scalar_lea.sflag [#allocation13], %s560_s9 }
 0x461   : > { %1048 = dma.done.wait (%p754_p1), %s570_s14, 16  }
 0x462   : > { %1050 = vsyncadd (%p754_p1), %s570_s14, 4294967280  ;;  %s1373_s24 = sld [smem:[#allocation21_spill]]  ;;  %s1376_s21 = smov %s1057_s22 }
 0x463   : > { %s1374_s20 = sld [smem:[#allocation19_spill]] }
 0x464   : > { %s1375_s23 = sld [smem:[#allocation22_spill]] }
 0x468   : > { %p27_p5 = scmp.ge.s32.totalorder %s1373_s24, 6  }
 0x469   : > { %s1377_s22 = smov %s1374_s20 }
 0x46a   :  { %29 = sbr.rel (!%p27_p5) target bundleno = 12 (0xc), region = 134 }
 0x46f   :  { %575 = vsyncpa [#allocation3], 1 }
 0x470   :  { %577 = vsyncpa [#allocation3 + $0x1], 1 }
 0x471   :  { %578 = vsyncpa [#allocation6], 1 }
 0x472   :  { %580 = vsyncpa [#allocation6 + $0x1], 1 }
 0x473   :  { %581 = vsyncpa [#allocation9], 1 }
 0x474   :  { %582 = vsyncpa [#allocation4], 1 }
 0x475   :  { %584 = vsyncpa [#allocation4 + $0x1], 1 }
 0x476   :  { %585 = vsyncpa [#allocation13], 1 }
 0x477   :  { %587 = vsyncpa [#allocation13 + $0x1], 1 }

</bundles_post_ra>
